<compile_context>
chip_gen: v5e
topology: v5e:2x2
jax: 0.10.0
libtpu: 0.0.40
codegen_flags: <defaults>
</compile_context>

<pallas_src>
import functools

import jax
import jax.numpy as jnp
from jax.experimental import pallas as pl
from jax.experimental.pallas import tpu as pltpu


def _round_up(x, m):
    return ((x + m - 1) // m) * m


# ----------------------------------------------------------------------------
# Fused kernel:  h = sta;  for each layer:  h = act(h @ W_j + b_j)
# All intermediates live in vregs/VMEM; one kernel launch per forward pass.
# ----------------------------------------------------------------------------
def _fused_mlp_kernel(*refs, n_layers, compute_dtype, hidden_activation):
    # refs = (x_ref, w0_ref, b0_ref, w1_ref, b1_ref, ..., o_ref)
    x_ref = refs[0]
    o_ref = refs[-1]
    wb_refs = refs[1:-1]

    h = x_ref[...].astype(compute_dtype)             # (bt, sta_dim)
    for j in range(n_layers):
        w = wb_refs[2 * j][...]                       # (in, out), compute_dtype
        b = wb_refs[2 * j + 1][...]                   # (1, out), f32
        # MXU matmul with f32 accumulation; bias + activation epilogue in f32.
        y = jnp.dot(h, w, preferred_element_type=jnp.float32) + b
        if j < n_layers - 1:
            h = hidden_activation(y).astype(compute_dtype)  # hidden act (Tanh)
        else:
            h = jax.nn.sigmoid(y)                     # output act (Sigmoid)
    o_ref[...] = h.astype(o_ref.dtype)


# ----------------------------------------------------------------------------
# Parameter init (Xavier/Glorot uniform weights, PyTorch-default bias init)
# ----------------------------------------------------------------------------
def init_mlp_params(key, sizes, gain=1.0):
    params = []
    for j in range(len(sizes) - 1):
        fan_in, fan_out = sizes[j], sizes[j + 1]
        key, kw, kb = jax.random.split(key, 3)
        limit = gain * jnp.sqrt(6.0 / (fan_in + fan_out))
        w = jax.random.uniform(
            kw, (fan_out, fan_in), minval=-limit, maxval=limit, dtype=jnp.float32
        )
        b_lim = 1.0 / jnp.sqrt(jnp.float32(fan_in))
        b = jax.random.uniform(
            kb, (fan_out,), minval=-b_lim, maxval=b_lim, dtype=jnp.float32
        )
        params.append((w, b))
    return params


# ----------------------------------------------------------------------------
# One-time parameter preprocessing: transpose to (in, out), cast weights.
# No padding anywhere -- real feature dims (16/32/8) are used directly.
# ----------------------------------------------------------------------------
def prepare_params(params, compute_dtype=jnp.bfloat16):
    """params: list of (w (out, in), b (out,)) in PyTorch layout."""
    dims = [params[0][0].shape[1]] + [w.shape[0] for w, _ in params]
    packed = []
    for w, b in params:
        w_t = jnp.transpose(w).astype(compute_dtype)        # (in, out)
        b_p = b.astype(jnp.float32).reshape(1, -1)           # f32 epilogue bias
        packed.append((w_t, b_p))
    return {"wb": packed, "dims": dims, "compute_dtype": compute_dtype}


def _pick_batch_tile(B, batch_tile):
    """Multiple-of-8 tile; >= 2 grid steps whenever B > 8 (v7x megacore)."""
    batch_tile = max(8, (batch_tile // 8) * 8)
    if B <= 8:
        return 8
    half = _round_up((B + 1) // 2, 8)
    return min(batch_tile, half)


# ----------------------------------------------------------------------------
# MLPClassifier.forward  (single fused pallas_call, batch-tiled grid)
# ----------------------------------------------------------------------------
def mlp_classifier_forward(prep, sta, *, batch_tile=1024,
                           hidden_activation=jnp.tanh):
    wb = prep["wb"]
    dims = prep["dims"]
    cdt = prep["compute_dtype"]
    n_layers = len(wb)

    B, din = sta.shape
    assert din == dims[0], f"expected sta_dim={dims[0]}, got {din}"

    bt = _pick_batch_tile(B, batch_tile)
    grid = (pl.cdiv(B, bt),)

    kernel = functools.partial(
        _fused_mlp_kernel,
        n_layers=n_layers,
        compute_dtype=cdt,
        hidden_activation=hidden_activation,
    )

    # Input streamed at its real width (last dim == full array dim is legal);
    # cast to the compute dtype happens in-kernel (no extra XLA op).
    in_specs = [pl.BlockSpec((bt, din), lambda i: (i, 0))]
    flat_in = [sta]
    for w_t, b_p in wb:
        # Tiny weights/biases: full-array blocks with a constant index_map.
        # Pallas skips the re-DMA when the block index is unchanged, so they
        # are fetched once and stay VMEM-resident for the whole grid.
        in_specs.append(pl.BlockSpec(w_t.shape, lambda i: (0, 0)))
        in_specs.append(pl.BlockSpec(b_p.shape, lambda i: (0, 0)))
        flat_in += [w_t, b_p]

    # Honest (unpadded) cost estimate for XLA's scheduler.
    flops = 2 * B * sum(dims[j] * dims[j + 1] for j in range(n_layers))
    transcendentals = B * sum(dims[j + 1] for j in range(n_layers))
    bytes_accessed = (
        sta.size * sta.dtype.itemsize
        + sum(w.size * w.dtype.itemsize + b.size * b.dtype.itemsize
              for w, b in wb)
        + B * dims[-1] * 4
    )

    out = pl.pallas_call(
        kernel,
        out_shape=jax.ShapeDtypeStruct((B, dims[-1]), jnp.float32),
        grid_spec=pltpu.PrefetchScalarGridSpec(
            num_scalar_prefetch=0,
            grid=grid,
            in_specs=in_specs,
            out_specs=pl.BlockSpec((bt, dims[-1]), lambda i: (i, 0)),
        ),
        compiler_params=pltpu.CompilerParams(
            dimension_semantics=("parallel",),
        ),
        cost_estimate=pl.CostEstimate(
            flops=flops,
            transcendentals=transcendentals,
            bytes_accessed=bytes_accessed,
        ),
    )(*flat_in)

    return out  # (B, act_dim), nothing to slice


# ----------------------------------------------------------------------------
# Pure-JAX reference (mirrors the PyTorch module exactly)
# ----------------------------------------------------------------------------
def reference_forward(params, sta):
    x = sta
    n_layers = len(params)
    for j, (w, b) in enumerate(params):
        y = x @ w.T + b
        x = jnp.tanh(y) if j < n_layers - 1 else jax.nn.sigmoid(y)
    return x


if __name__ == "__main__":
    # Shapes consistent with the module's forward:
    #   sta_dim=16, hidden_sizes=(32, 32), act_dim=8, batch=8
    sta_dim, act_dim = 16, 8
    hidden_sizes = (32, 32)
    batch = 8

    key = jax.random.PRNGKey(0)
    key, k_sta, k_sta2 = jax.random.split(key, 3)
    sizes = [sta_dim] + list(hidden_sizes) + [act_dim]
    params = init_mlp_params(key, sizes, gain=1.0)

    sta = jax.random.normal(k_sta, (batch, sta_dim), dtype=jnp.float32)
    ref = reference_forward(params, sta)

    # --- f32 path: exact match vs reference ---------------------------------
    prep_f32 = prepare_params(params, compute_dtype=jnp.float32)
    out = mlp_classifier_forward(prep_f32, sta)
    out = jax.block_until_ready(out)
    assert out.shape == (batch, act_dim)
    assert jnp.allclose(out, ref, atol=1e-5, rtol=1e-5), "f32 mismatch vs reference"

    # --- multi-step grid, partial last block (B=300, no batch padding) -------
    big_batch = 300
    sta_big = jax.random.normal(k_sta2, (big_batch, sta_dim), dtype=jnp.float32)
    ref_big = reference_forward(params, sta_big)

    # Default tile: ceil(300/2)->152, grid=(2,), partial last block of 148.
    out_big = mlp_classifier_forward(prep_f32, sta_big)
    out_big = jax.block_until_ready(out_big)
    assert out_big.shape == (big_batch, act_dim)
    assert jnp.allclose(out_big, ref_big, atol=1e-5, rtol=1e-5), "grid path mismatch"

    # Explicit smaller tile: grid=(3,), last block covers only 44 real rows.
    out_big2 = mlp_classifier_forward(prep_f32, sta_big, batch_tile=128)
    out_big2 = jax.block_until_ready(out_big2)
    assert jnp.allclose(out_big2, ref_big, atol=1e-5, rtol=1e-5), "clip path mismatch"

    # --- bf16 streaming path (default), f32 accumulation + f32 epilogue ------
    prep_bf16 = prepare_params(params)   # default compute_dtype = bfloat16
    out_bf16 = mlp_classifier_forward(prep_bf16, sta)
    out_bf16 = jax.block_until_ready(out_bf16)
    assert out_bf16.shape == (batch, act_dim)
    assert jnp.allclose(out_bf16, ref, atol=2e-2, rtol=2e-2), "bf16 mismatch"

    print("KERNEL_OK")
</pallas_src>

<mosaic_0001>
module attributes {stable_mosaic.version = 11 : i64} {
  func.func @_fused_mlp_kernel(%arg0: i32, %arg1: memref<8x16xf32, #tpu.memory_space<vmem>>, %arg2: memref<16x32xf32, #tpu.memory_space<vmem>>, %arg3: memref<1x32xf32, #tpu.memory_space<vmem>>, %arg4: memref<32x32xf32, #tpu.memory_space<vmem>>, %arg5: memref<1x32xf32, #tpu.memory_space<vmem>>, %arg6: memref<32x8xf32, #tpu.memory_space<vmem>>, %arg7: memref<1x8xf32, #tpu.memory_space<vmem>>, %arg8: memref<8x8xf32, #tpu.memory_space<vmem>>) attributes {dimension_semantics = [#tpu.dimension_semantics<parallel>], iteration_bounds = array<i64: 1>, scalar_prefetch = 0 : i64, scratch_operands = 0 : i64, tpu.core_type = #tpu.core_type<tc>, window_params = [{transform_indices = @transform_0, window_bounds = array<i64: 8, 16>}, {pipeline_mode = #tpu.pipeline_mode<synchronous>, transform_indices = @transform_1, window_bounds = array<i64: 16, 32>}, {pipeline_mode = #tpu.pipeline_mode<synchronous>, transform_indices = @transform_2, window_bounds = array<i64: 1, 32>}, {pipeline_mode = #tpu.pipeline_mode<synchronous>, transform_indices = @transform_3, window_bounds = array<i64: 32, 32>}, {pipeline_mode = #tpu.pipeline_mode<synchronous>, transform_indices = @transform_4, window_bounds = array<i64: 1, 32>}, {pipeline_mode = #tpu.pipeline_mode<synchronous>, transform_indices = @transform_5, window_bounds = array<i64: 32, 8>}, {pipeline_mode = #tpu.pipeline_mode<synchronous>, transform_indices = @transform_6, window_bounds = array<i64: 1, 8>}, {transform_indices = @transform_7, window_bounds = array<i64: 8, 8>}]} {
    %c0 = arith.constant 0 : index
    %c0_0 = arith.constant 0 : index
    %0 = vector.load %arg1[%c0, %c0_0] : memref<8x16xf32, #tpu.memory_space<vmem>>, vector<8x16xf32>
    %c0_1 = arith.constant 0 : index
    %c0_2 = arith.constant 0 : index
    %1 = vector.load %arg2[%c0_1, %c0_2] : memref<16x32xf32, #tpu.memory_space<vmem>>, vector<16x32xf32>
    %c0_3 = arith.constant 0 : index
    %c0_4 = arith.constant 0 : index
    %2 = vector.load %arg3[%c0_3, %c0_4] : memref<1x32xf32, #tpu.memory_space<vmem>>, vector<1x32xf32>
    %cst = arith.constant dense<0.000000e+00> : vector<8x32xf32>
    %3 = tpu.matmul %0, %1, %cst {dimension_numbers = #tpu.dot_dimension_numbers<[1], [0], [0], [1], [0, 0, 1, 1], [], []>} : vector<8x16xf32>, vector<16x32xf32>, vector<8x32xf32> -> vector<8x32xf32>
    %4 = vector.broadcast %2 : vector<1x32xf32> to vector<8x32xf32>
    %5 = arith.addf %3, %4 : vector<8x32xf32>
    %6 = math.tanh %5 : vector<8x32xf32>
    %c0_5 = arith.constant 0 : index
    %c0_6 = arith.constant 0 : index
    %7 = vector.load %arg4[%c0_5, %c0_6] : memref<32x32xf32, #tpu.memory_space<vmem>>, vector<32x32xf32>
    %c0_7 = arith.constant 0 : index
    %c0_8 = arith.constant 0 : index
    %8 = vector.load %arg5[%c0_7, %c0_8] : memref<1x32xf32, #tpu.memory_space<vmem>>, vector<1x32xf32>
    %cst_9 = arith.constant dense<0.000000e+00> : vector<8x32xf32>
    %9 = tpu.matmul %6, %7, %cst_9 {dimension_numbers = #tpu.dot_dimension_numbers<[1], [0], [0], [1], [0, 0, 1, 1], [], []>} : vector<8x32xf32>, vector<32x32xf32>, vector<8x32xf32> -> vector<8x32xf32>
    %10 = vector.broadcast %8 : vector<1x32xf32> to vector<8x32xf32>
    %11 = arith.addf %9, %10 : vector<8x32xf32>
    %12 = math.tanh %11 : vector<8x32xf32>
    %c0_10 = arith.constant 0 : index
    %c0_11 = arith.constant 0 : index
    %13 = vector.load %arg6[%c0_10, %c0_11] : memref<32x8xf32, #tpu.memory_space<vmem>>, vector<32x8xf32>
    %c0_12 = arith.constant 0 : index
    %c0_13 = arith.constant 0 : index
    %14 = vector.load %arg7[%c0_12, %c0_13] : memref<1x8xf32, #tpu.memory_space<vmem>>, vector<1x8xf32>
    %cst_14 = arith.constant dense<0.000000e+00> : vector<8x8xf32>
    %15 = tpu.matmul %12, %13, %cst_14 {dimension_numbers = #tpu.dot_dimension_numbers<[1], [0], [0], [1], [0, 0, 1, 1], [], []>} : vector<8x32xf32>, vector<32x8xf32>, vector<8x8xf32> -> vector<8x8xf32>
    %16 = vector.broadcast %14 : vector<1x8xf32> to vector<8x8xf32>
    %17 = arith.addf %15, %16 : vector<8x8xf32>
    %18 = arith.negf %17 : vector<8x8xf32>
    %19 = math.exp %18 : vector<8x8xf32>
    %cst_15 = arith.constant 1.000000e+00 : f32
    %20 = vector.broadcast %cst_15 : f32 to vector<8x8xf32>
    %21 = arith.addf %20, %19 : vector<8x8xf32>
    %22 = arith.divf %20, %21 : vector<8x8xf32>
    %c0_16 = arith.constant 0 : index
    %c0_17 = arith.constant 0 : index
    %23 = vector.load %arg8[%c0_16, %c0_17] : memref<8x8xf32, #tpu.memory_space<vmem>>, vector<8x8xf32>
    tpu.vector_store %arg8[%c0_16, %c0_17], %22 {strides = array<i32>} : memref<8x8xf32, #tpu.memory_space<vmem>>, vector<8x8xf32>,
    return
  }
  func.func @transform_0(%arg0: i32) -> (i32, i32) {
    %c0_i32 = arith.constant 0 : i32
    %c0_i32_0 = arith.constant 0 : i32
    return %arg0, %c0_i32 : i32, i32
  }
  func.func @transform_1(%arg0: i32) -> (i32, i32) {
    %c0_i32 = arith.constant 0 : i32
    %c0_i32_0 = arith.constant 0 : i32
    %c0_i32_1 = arith.constant 0 : i32
    return %c0_i32, %c0_i32_0 : i32, i32
  }
  func.func @transform_2(%arg0: i32) -> (i32, i32) {
    %c0_i32 = arith.constant 0 : i32
    %c0_i32_0 = arith.constant 0 : i32
    %c0_i32_1 = arith.constant 0 : i32
    return %c0_i32, %c0_i32_0 : i32, i32
  }
  func.func @transform_3(%arg0: i32) -> (i32, i32) {
    %c0_i32 = arith.constant 0 : i32
    %c0_i32_0 = arith.constant 0 : i32
    %c0_i32_1 = arith.constant 0 : i32
    return %c0_i32, %c0_i32_0 : i32, i32
  }
  func.func @transform_4(%arg0: i32) -> (i32, i32) {
    %c0_i32 = arith.constant 0 : i32
    %c0_i32_0 = arith.constant 0 : i32
    %c0_i32_1 = arith.constant 0 : i32
    return %c0_i32, %c0_i32_0 : i32, i32
  }
  func.func @transform_5(%arg0: i32) -> (i32, i32) {
    %c0_i32 = arith.constant 0 : i32
    %c0_i32_0 = arith.constant 0 : i32
    %c0_i32_1 = arith.constant 0 : i32
    return %c0_i32, %c0_i32_0 : i32, i32
  }
  func.func @transform_6(%arg0: i32) -> (i32, i32) {
    %c0_i32 = arith.constant 0 : i32
    %c0_i32_0 = arith.constant 0 : i32
    %c0_i32_1 = arith.constant 0 : i32
    return %c0_i32, %c0_i32_0 : i32, i32
  }
  func.func @transform_7(%arg0: i32) -> (i32, i32) {
    %c0_i32 = arith.constant 0 : i32
    %c0_i32_0 = arith.constant 0 : i32
    return %arg0, %c0_i32 : i32, i32
  }
}

</mosaic_0001>

<bundles_post_ra>
// kernel: tpu_custom_call.1
= control target key start
LH: loop header
LB: loop body
LE: loop exit
PB: predicated region body
PF: predicated region fallthrough
CT: control target
= control target key end

     0   :  { %12 = vsyncpa [#allocation3], 0  ;;  %s336_s0 = inlined_call_operand.vmem [shape: f32[8,16], index: 0, kind: input, shape index: {}]   ;;  %s337_s1 = inlined_call_operand.hbm [shape: f32[16,32], index: 1, kind: input, shape index: {}]   ;;  %s338_s2 = inlined_call_operand.vmem [shape: f32[1,32], index: 2, kind: input, shape index: {}]   ;;  %s339_s3 = inlined_call_operand.vmem [shape: f32[32,32], index: 3, kind: input, shape index: {}]   ;;  %s340_s4 = inlined_call_operand.vmem [shape: f32[1,32], index: 4, kind: input, shape index: {}]   ;;  %s341_s5 = inlined_call_operand.vmem [shape: f32[32,8], index: 5, kind: input, shape index: {}]   ;;  %s342_s6 = inlined_call_operand.vmem [shape: f32[1,8], index: 6, kind: input, shape index: {}]   ;;  %s343_s7 = inlined_call_operand.hbm [shape: f32[8,8], index: 7, kind: output, shape index: {}]  }
   0x1   :  { %13 = vsyncpa [#allocation4], 0  ;;  %s20_s26 = sshll.u32 %s337_s1, 4  ;;  %s248_s27 = smov [#allocation2]   ;;  %s21_s26 = int_to_ptr.hbm [resolvable:$true] %s20_s26 }
   0x2   :  { %s22_s28 = sshll.u32 %s248_s27, 4  ;;  %s249_s29 = smov 128   ;;  %s23_s28 = int_to_ptr.vmem [resolvable:$true] %s22_s28 }
   0x3   :  { %s250_s30 = smov 8  }
   0x4   :  { %28 = dma.hbm_to_vmem [thread:$0]  %s21_s26, 256, %s23_s28, [#allocation3], %s249_s29, %s249_s29, %s250_s30  }
   0x5   :  { %244 = dma.done.wait [#allocation3], 256  }
   0x6   :  { %245 = vsyncadd [#allocation3], 4294967040  ;;  %v45_v0 = vld [vmem:[#allocation2 + $0x8] sm:$0xff]  ;;  %v44_v1 = vld [vmem:[#allocation2] sm:$0xff]  ;;  %vm50_vm0 = vcmask 130048   ;;  %vm83_vm1 = vcmask 261120  }
   0x7   :  { %68 = vmatpush.msra.mxu0 %v45_v0  ;;  %v43_v2 = vld [vmem:[%s336_s0] sm:$0xff]  ;;  %v78_v3 = vld [vmem:[%s339_s3 + $0x18] sm:$0xff]  ;;  %v77_v4 = vld [vmem:[%s339_s3 + $0x10] sm:$0xff]  ;;  %vm158_vm5 = vcmask 64512  }
   0x8   :  { %99 = vmatpush.msra.mxu1 %v78_v3  ;;  %v76_v5 = vld [vmem:[%s339_s3 + $0x8] sm:$0xff]  ;;  %v75_v6 = vld [vmem:[%s339_s3] sm:$0xff]  ;;  %v111_v11 = vld [vmem:[%s341_s5 + $0x18] sm:$0xff] }
   0x9   :  { %69 = vmatpush.msra.mxu0 %v44_v1  ;;  %v185_v7 = vld [vmem:[%s338_s2] ss:$0 sm:$0xff]  ;;  %131 = vmatpush.msra.mxu2 %v111_v11  ;;  %v110_v12 = vld [vmem:[%s341_s5 + $0x10] sm:$0xff]  ;;  %v109_v13 = vld [vmem:[%s341_s5 + $0x8] sm:$0xff] }
   0xa   :  { %177 = vmatmul.msk.f32.vlgmr.msra.gmra.mxu0 %vm50_vm0, %v43_v2  ;;  %100 = vmatpush.msra.mxu1 %v77_v4  ;;  %v108_v14 = vld [vmem:[%s341_s5] sm:$0xff] }
   0xb   :  { %132 = vmatpush.msra.mxu2 %v110_v12  ;;  %v186_v15 = vld [vmem:[%s340_s4] ss:$0 sm:$0xff]  ;;  %s251_s4 = smov [#allocation5]  }
   0xc   :  { %101 = vmatpush.msra.mxu1 %v76_v5  ;;  %v187_v19 = vld [vmem:[%s342_s6] ss:$0 sm:$0xff]  ;;  %s165_s5 = sshll.u32 %s251_s4, 4  ;;  %s167_s6 = sshll.u32 %s343_s7, 4  ;;  %s166_s5 = int_to_ptr.vmem [resolvable:$true] %s165_s5  ;;  %s168_s6 = int_to_ptr.hbm [resolvable:$true] %s167_s6 }
   0xd   :  { %133 = vmatpush.msra.mxu2 %v109_v13 }
   0xe   :  { %102 = vmatpush.msra.mxu1 %v75_v6 }
   0xf   :  { %134 = vmatpush.msra.mxu2 %v108_v14 }
  0x87   :  { %v71_v8 = vpop.f32.mrf.mxu0 }
  0x88   :  { %v72_v9 = vadd.f32 %v185_v7, %v71_v8 }
  0x8a   :  { %188 = vtanh.f32 %v72_v9 }
  0x90   :  { %v189_v10 = vpop.eup %188 }
  0x91   :  { %178 = vmatmul.msk.f32.vlgmr.msra.gmra.mxu1 %vm83_vm1, %v189_v10 }
 0x10e   :  { %v104_v16 = vpop.f32.mrf.mxu1 }
 0x10f   :  { %v105_v17 = vadd.f32 %v186_v15, %v104_v16 }
 0x111   :  { %190 = vtanh.f32 %v105_v17 }
 0x117   :  { %v191_v18 = vpop.eup %190 }
 0x118   :  { %179 = vmatmul.msk.f32.vlgmr.msra.gmra.mxu2 %vm83_vm1, %v191_v18 }
 0x19b   :  { %v136_v20 = vpop.f32.mrf.mxu2 }
 0x19c   :  { %v137_v21 = vadd.f32 %v187_v19, %v136_v20 }
 0x19e   :  { %v180_v22 = vmul.f32 -1.442695, %v137_v21 }
 0x1a0   :  { %192 = vpow2.f32 %v180_v22 }
 0x1a6   :  { %v193_v23 = vpop.eup %192 }
 0x1a7   :  { %v142_v24 = vadd.f32 1.0, %v193_v23 }
 0x1a9   :  { %194 = vrcp.f32 %v142_v24  ;;  %v154_v28 = vand.u32 2147483648, %v142_v24  ;;  %v152_v30 = vand.u32 2147483647, %v142_v24  ;;  %vm148_vm3 = vweird.f32 %v142_v24 }
 0x1ab   :  { %v155_v32 = vor.u32 1.1754944e-38, %v154_v28  ;;  %vm153_vm6 = vcmp.eq.f32.partialorder %v152_v30, 8.507059e+37 }
 0x1af   :  { %v195_v25 = vpop.eup %194 }
 0x1b0   :  { %v144_v26 = vmul.f32 %v195_v25, %v142_v24  ;;  %vm149_vm2 = vweird.f32 %v195_v25 }
 0x1b1   :  { %vm150_vm4 = vmor %vm148_vm3, %vm149_vm2 }
 0x1b2   :  { %v145_v27 = vsub.f32 1.0, %v144_v26 }
 0x1b4   :  { %v146_v29 = vmul.f32 %v195_v25, %v145_v27 }
 0x1b6   :  { %v147_v31 = vadd.f32 %v195_v25, %v146_v29 }
 0x1b8   :  { %v151_v33 = vsel %vm150_vm4, %v195_v25, %v147_v31 }
 0x1b9   :  { %v156_v34 = vsel %vm153_vm6, %v155_v32, %v151_v33 }
 0x1ba   :  { %159 = vst.msk [vmem:[#allocation5] sm:$0xff] %vm158_vm5, %v156_v34 }
 0x1bb   :  { %170 = dma.vmem_to_hbm [thread:$0]  %s166_s5, 128, %s168_s6, [#allocation4]  }
 0x1bc   :  { %246 = dma.done.wait [#allocation4], 128  }
 0x1bd   :  { %247 = vsyncadd [#allocation4], 4294967168 }
 0x1be   :  { %175 = vsyncpa [#allocation3], 1 }
 0x1bf   :  { %176 = vsyncpa [#allocation4], 1 }

</bundles_post_ra>
